<compile_context>
chip_gen: v7x
topology: tpu7x:2x2x1
jax: 0.10.0
libtpu: 0.0.40
codegen_flags: <defaults>
</compile_context>

<pallas_src>
import functools

import jax
import jax.numpy as jnp
import numpy as np
from jax.experimental import pallas as pl
from jax.experimental.pallas import tpu as pltpu

INPUT_DIM = 324          # 54 stickers x 6 colors
IN_PAD = 384             # 3 x 128 lanes (zero padded)
OUTPUT_DIM = 18
HEAD_PAD = 256           # lane-dense + fills 256-wide MXU on v6e/v7x
BN_EPS = 1e-5


def mlp_kernel(n_ref, x_ref, w_emb_ref, w_fc_ref, bn_ref, w_head_ref,
               out_ref, h_ref, z_ref):
    """One grid step == one K-slab of one LinearBlock.

    n_ref:      (1,)           int32 SMEM scalar-prefetch: true batch size
    x_ref:      (Bp, 384)      bf16 one-hot state (zero padded), resident
    w_emb_ref:  (384, H)       bf16, resident
    w_fc_ref:   (1, TK, H)     bf16, streamed per (layer, k)
    bn_ref:     (1, 3, H)      f32 [bias; gamma; beta], streamed per layer
    w_head_ref: (H, 256)       bf16 (zero-padded 18->256), resident
    out_ref:    (Bp, 256)      f32 logits (padded), written at the last step
    h_ref:      (n_k, Bp, TK)  bf16 persistent activation scratch (K-chunked)
    z_ref:      (Bp, H)        f32 pre-activation accumulator scratch
    """
    layer = pl.program_id(0)
    k = pl.program_id(1)
    num_layers = pl.num_programs(0)
    num_k = pl.num_programs(1)
    n_k, b_pad, tk = h_ref.shape

    # ---- (layer 0, k 0): embedding Linear(324->H), no bias, no activation ----
    @pl.when((layer == 0) & (k == 0))
    def _embed():
        emb = jnp.dot(x_ref[...], w_emb_ref[...],
                      preferred_element_type=jnp.float32).astype(jnp.bfloat16)
        for i in range(n_k):
            h_ref[i] = emb[:, i * tk:(i + 1) * tk]

    # ---- K-tiled Linear: z += h[:, k-slab] @ w_fc[layer, k-slab, :] ----
    @pl.when(k == 0)
    def _zero():
        z_ref[...] = jnp.zeros_like(z_ref)

    z_ref[...] += jnp.dot(h_ref[k], w_fc_ref[0],
                          preferred_element_type=jnp.float32)

    # ---- last K step: bias + ReLU + BatchNorm1d (training-mode stats) ----
    @pl.when(k == num_k - 1)
    def _bn():
        bn = bn_ref[0]                                   # (3, H) f32
        bias, gamma, beta = bn[0:1, :], bn[1:2, :], bn[2:3, :]
        z = jnp.maximum(z_ref[...] + bias, 0.0)

        # Padded batch rows of z are all identically relu(bias) (propagated
        # from the zero-padded input rows), so the true-batch sums are the
        # full-tile sums minus (Bp - n) times that (single) padded row.
        n = n_ref[0]
        inv_n = 1.0 / n.astype(jnp.float32)
        n_pad = (b_pad - n).astype(jnp.float32)
        z_pad = z[b_pad - 1:b_pad, :]        # a padded row iff n < Bp
        mean = (jnp.sum(z, axis=0, keepdims=True) - n_pad * z_pad) * inv_n
        mean_sq = (jnp.sum(z * z, axis=0, keepdims=True)
                   - n_pad * z_pad * z_pad) * inv_n
        var = jnp.maximum(mean_sq - mean * mean, 0.0)    # clamp cancellation

        scale = gamma * jax.lax.rsqrt(var + BN_EPS)
        shift = beta - mean * scale
        h_new = (z * scale + shift).astype(jnp.bfloat16)
        for i in range(n_k):
            h_ref[i] = h_new[:, i * tk:(i + 1) * tk]

    # ---- last layer, last K step: head Linear(H->18), lane-padded to 256 ----
    @pl.when((layer == num_layers - 1) & (k == num_k - 1))
    def _head():
        h_full = jnp.concatenate([h_ref[i] for i in range(n_k)], axis=-1)
        out_ref[...] = jnp.dot(h_full, w_head_ref[...],
                               preferred_element_type=jnp.float32)


def _round_up(x, m):
    return -(-x // m) * m


def _choose_tk(hidden):
    """Contraction tile so the double-buffered streamed weight slab
    (2 * TK * H * 2B) stays ~<= 20 MiB (fits v7x's 64 MiB VMEM with room)."""
    budget = 20 * 1024 * 1024
    tk = min(hidden, max(128, (budget // (4 * hidden)) // 128 * 128))
    while hidden % tk:
        tk -= 128
    return max(tk, 128)


def _vmem_budget_bytes(b_pad, hidden, tk):
    """2x only the streamed tiles + 1x residents + scratch + slack."""
    streamed = tk * hidden * 2 + 3 * hidden * 4           # w_fc slab + bn pack
    resident = (b_pad * IN_PAD * 2                         # x (bf16)
                + IN_PAD * hidden * 2                      # w_emb (bf16)
                + hidden * HEAD_PAD * 2                    # w_head (bf16)
                + b_pad * HEAD_PAD * 4)                    # out (f32)
    scratch = b_pad * hidden * 2 + b_pad * hidden * 4      # h (bf16) + z (f32)
    return int(2 * streamed + resident + scratch + (4 << 20))


@functools.partial(jax.jit, static_argnames=("tk",))
def model_forward(tokens, w_emb, w_fc, b_fc, gamma, beta, w_head, *, tk=None):
    batch = tokens.shape[0]
    num_layers, _, hidden = w_fc.shape
    assert hidden % 128 == 0
    if tk is None:
        tk = _choose_tk(hidden)
    assert hidden % tk == 0
    n_k = hidden // tk

    # glue: one_hot(inputs, 6).reshape(-1, 324); pad K 324->384 and batch to a
    # bf16 sublane multiple (16). All padding is zeros.
    b_pad = max(16, _round_up(batch, 16))
    x = jax.nn.one_hot(tokens, 6, dtype=jnp.bfloat16).reshape(-1, INPUT_DIM)
    x = jnp.pad(x, ((0, b_pad - batch), (0, IN_PAD - INPUT_DIM)))
    w_emb_p = jnp.pad(w_emb.astype(jnp.bfloat16),
                      ((0, IN_PAD - INPUT_DIM), (0, 0)))
    w_head_p = jnp.pad(w_head.astype(jnp.bfloat16),
                       ((0, 0), (0, HEAD_PAD - w_head.shape[1])))
    # bias / gamma / beta packed into a single (L, 3, H) block: 1 DMA / layer.
    bn = jnp.stack([b_fc, gamma, beta], axis=1).astype(jnp.float32)
    n_true = jnp.array([batch], dtype=jnp.int32)           # scalar prefetch

    out = pl.pallas_call(
        mlp_kernel,
        out_shape=jax.ShapeDtypeStruct((b_pad, HEAD_PAD), jnp.float32),
        grid_spec=pltpu.PrefetchScalarGridSpec(
            num_scalar_prefetch=1,
            grid=(num_layers, n_k),
            in_specs=[
                pl.BlockSpec((b_pad, IN_PAD), lambda l, k, n: (0, 0)),      # x
                pl.BlockSpec((IN_PAD, hidden), lambda l, k, n: (0, 0)),     # w_emb
                pl.BlockSpec((1, tk, hidden), lambda l, k, n: (l, k, 0)),   # w_fc slab
                pl.BlockSpec((1, 3, hidden), lambda l, k, n: (l, 0, 0)),    # bn pack
                pl.BlockSpec((hidden, HEAD_PAD), lambda l, k, n: (0, 0)),   # w_head
            ],
            out_specs=pl.BlockSpec((b_pad, HEAD_PAD), lambda l, k, n: (0, 0)),
            scratch_shapes=[
                pltpu.VMEM((n_k, b_pad, tk), jnp.bfloat16),   # persistent h
                pltpu.VMEM((b_pad, hidden), jnp.float32),     # z accumulator
            ],
        ),
        compiler_params=pltpu.CompilerParams(
            dimension_semantics=("arbitrary", "arbitrary"),
            vmem_limit_bytes=_vmem_budget_bytes(b_pad, hidden, tk),
        ),
    )(n_true, x, w_emb_p, w_fc.astype(jnp.bfloat16), bn, w_head_p)

    return out[:batch, :OUTPUT_DIM]


def reference_forward(tokens, w_emb, w_fc, b_fc, gamma, beta, w_head):
    """Pure-JAX reference mirroring the PyTorch forward (training-mode BN)
    with the same bf16-weight / bf16-activation / f32-accumulate precision."""
    x = jax.nn.one_hot(tokens, 6, dtype=jnp.bfloat16).reshape(-1, INPUT_DIM)
    h = jnp.dot(x, w_emb.astype(jnp.bfloat16),
                preferred_element_type=jnp.float32).astype(jnp.bfloat16)
    for l in range(w_fc.shape[0]):
        z = jnp.dot(h, w_fc[l].astype(jnp.bfloat16),
                    preferred_element_type=jnp.float32)
        z = jnp.maximum(z + b_fc[l][None, :], 0.0)
        mean = jnp.mean(z, axis=0, keepdims=True)
        var = jnp.maximum(jnp.mean(z * z, axis=0, keepdims=True)
                          - mean * mean, 0.0)
        scale = gamma[l][None, :] * jax.lax.rsqrt(var + BN_EPS)
        h = (z * scale + (beta[l][None, :] - mean * scale)).astype(jnp.bfloat16)
    return jnp.dot(h, w_head.astype(jnp.bfloat16),
                   preferred_element_type=jnp.float32)


if __name__ == "__main__":
    key = jax.random.PRNGKey(0)
    k_tok, k_emb, k_fc, k_head = jax.random.split(key, 4)

    batch = 8
    hidden = 256          # small stand-in for hidden_size=4096
    num_layers = 2        # small stand-in for num_hidden_layers=8

    # Input: integer cube state, 54 stickers with values in [0, 6).
    tokens = jax.random.randint(k_tok, (batch, 54), 0, 6, dtype=jnp.int32)

    # Parameter init following the module's reset_parameters(); big weights
    # stored pre-transposed (in_features, out_features).
    w_emb = jax.random.normal(k_emb, (INPUT_DIM, hidden), jnp.float32) / np.sqrt(54.0)
    w_fc = (jax.random.normal(k_fc, (num_layers, hidden, hidden), jnp.float32)
            * np.sqrt(2.0 / hidden))
    b_fc = jnp.zeros((num_layers, hidden), jnp.float32)
    gamma = jnp.ones((num_layers, hidden), jnp.float32)     # BN default affine
    beta = jnp.zeros((num_layers, hidden), jnp.float32)
    # NOTE: the original module zero-inits the head; small random init here so
    # the output is non-trivial and checkable.
    w_head = jax.random.normal(k_head, (hidden, OUTPUT_DIM), jnp.float32) * 0.02

    # tk=128 so the K-tiled contraction path (n_k=2) is exercised at toy size.
    out = model_forward(tokens, w_emb, w_fc, b_fc, gamma, beta, w_head, tk=128)
    out = jax.block_until_ready(out)

    ref = reference_forward(tokens, w_emb, w_fc, b_fc, gamma, beta, w_head)
    np.testing.assert_allclose(np.asarray(out), np.asarray(ref),
                               rtol=1e-2, atol=1e-2)
    print("KERNEL_OK")
</pallas_src>

<mosaic_0001>
module attributes {stable_mosaic.version = 11 : i64} {
  func.func @mlp_kernel(%arg0: i32, %arg1: i32, %arg2: memref<1xi32, #tpu.memory_space<smem>>, %arg3: memref<16x384xbf16, #tpu.memory_space<vmem>>, %arg4: memref<384x256xbf16, #tpu.memory_space<vmem>>, %arg5: memref<1x128x256xbf16, #tpu.memory_space<vmem>>, %arg6: memref<1x3x256xf32, #tpu.memory_space<vmem>>, %arg7: memref<256x256xbf16, #tpu.memory_space<vmem>>, %arg8: memref<16x256xf32, #tpu.memory_space<vmem>>, %arg9: memref<2x16x128xbf16, #tpu.memory_space<vmem>>, %arg10: memref<16x256xf32, #tpu.memory_space<vmem>>) attributes {dimension_semantics = [#tpu.dimension_semantics<arbitrary>, #tpu.dimension_semantics<arbitrary>], iteration_bounds = array<i64: 2, 2>, scalar_prefetch = 1 : i64, scratch_operands = 2 : i64, tpu.core_type = #tpu.core_type<tc>, window_params = [{pipeline_mode = #tpu.pipeline_mode<synchronous>, transform_indices = @transform_0, window_bounds = array<i64: 16, 384>}, {pipeline_mode = #tpu.pipeline_mode<synchronous>, transform_indices = @transform_1, window_bounds = array<i64: 384, 256>}, {transform_indices = @transform_2, window_bounds = array<i64: 1, 128, 256>}, {transform_indices = @transform_3, window_bounds = array<i64: 1, 3, 256>}, {pipeline_mode = #tpu.pipeline_mode<synchronous>, transform_indices = @transform_4, window_bounds = array<i64: 256, 256>}, {pipeline_mode = #tpu.pipeline_mode<synchronous>, transform_indices = @transform_5, window_bounds = array<i64: 16, 256>}]} {
    %c0_i32 = arith.constant 0 : i32
    %0 = arith.cmpi eq, %arg0, %c0_i32 : i32
    %c0_i32_0 = arith.constant 0 : i32
    %1 = arith.cmpi eq, %arg1, %c0_i32_0 : i32
    %2 = arith.andi %0, %1 : i1
    %3 = arith.extui %2 : i1 to i32
    %c0_i32_1 = arith.constant 0 : i32
    %4 = arith.cmpi ne, %3, %c0_i32_1 : i32
    scf.if %4 {
      %c0_16 = arith.constant 0 : index
      %c0_17 = arith.constant 0 : index
      %25 = vector.load %arg3[%c0_16, %c0_17] : memref<16x384xbf16, #tpu.memory_space<vmem>>, vector<16x384xbf16>
      %c0_18 = arith.constant 0 : index
      %c0_19 = arith.constant 0 : index
      %26 = vector.load %arg4[%c0_18, %c0_19] : memref<384x256xbf16, #tpu.memory_space<vmem>>, vector<384x256xbf16>
      %cst_20 = arith.constant dense<0.000000e+00> : vector<16x256xf32>
      %27 = tpu.matmul %25, %26, %cst_20 {dimension_numbers = #tpu.dot_dimension_numbers<[1], [0], [0], [1], [0, 0, 1, 1], [], []>} : vector<16x384xbf16>, vector<384x256xbf16>, vector<16x256xf32> -> vector<16x256xf32>
      %28 = arith.truncf %27 : vector<16x256xf32> to vector<16x256xbf16>
      %29 = vector.extract_strided_slice %28 {offsets = [0, 0], sizes = [16, 128], strides = [1, 1]} : vector<16x256xbf16> to vector<16x128xbf16>
      %c0_21 = arith.constant 0 : index
      %c0_22 = arith.constant 0 : index
      %c0_23 = arith.constant 0 : index
      %30 = vector.load %arg9[%c0_21, %c0_22, %c0_23] : memref<2x16x128xbf16, #tpu.memory_space<vmem>>, vector<1x16x128xbf16>
      %31 = vector.shape_cast %30 : vector<1x16x128xbf16> to vector<16x128xbf16>
      %32 = vector.shape_cast %29 : vector<16x128xbf16> to vector<1x16x128xbf16>
      tpu.vector_store %arg9[%c0_21, %c0_22, %c0_23], %32 {strides = array<i32>} : memref<2x16x128xbf16, #tpu.memory_space<vmem>>, vector<1x16x128xbf16>,
      %33 = vector.extract_strided_slice %28 {offsets = [0, 128], sizes = [16, 128], strides = [1, 1]} : vector<16x256xbf16> to vector<16x128xbf16>
      %c1 = arith.constant 1 : index
      %c0_24 = arith.constant 0 : index
      %c0_25 = arith.constant 0 : index
      %34 = vector.load %arg9[%c1, %c0_24, %c0_25] : memref<2x16x128xbf16, #tpu.memory_space<vmem>>, vector<1x16x128xbf16>
      %35 = vector.shape_cast %34 : vector<1x16x128xbf16> to vector<16x128xbf16>
      %36 = vector.shape_cast %33 : vector<16x128xbf16> to vector<1x16x128xbf16>
      tpu.vector_store %arg9[%c1, %c0_24, %c0_25], %36 {strides = array<i32>} : memref<2x16x128xbf16, #tpu.memory_space<vmem>>, vector<1x16x128xbf16>,
    } else {
    }
    %c0_i32_2 = arith.constant 0 : i32
    %5 = arith.cmpi eq, %arg1, %c0_i32_2 : i32
    %6 = arith.extui %5 : i1 to i32
    %c0_i32_3 = arith.constant 0 : i32
    %7 = arith.cmpi ne, %6, %c0_i32_3 : i32
    scf.if %7 {
      %cst_16 = arith.constant 0.000000e+00 : f32
      %25 = vector.broadcast %cst_16 : f32 to vector<16x256xf32>
      %c0_17 = arith.constant 0 : index
      %c0_18 = arith.constant 0 : index
      %26 = vector.load %arg10[%c0_17, %c0_18] : memref<16x256xf32, #tpu.memory_space<vmem>>, vector<16x256xf32>
      tpu.vector_store %arg10[%c0_17, %c0_18], %25 {strides = array<i32>} : memref<16x256xf32, #tpu.memory_space<vmem>>, vector<16x256xf32>,
    } else {
    }
    %c0 = arith.constant 0 : index
    %c0_4 = arith.constant 0 : index
    %8 = vector.load %arg10[%c0, %c0_4] : memref<16x256xf32, #tpu.memory_space<vmem>>, vector<16x256xf32>
    %9 = arith.index_cast %arg1 : i32 to index
    %c0_5 = arith.constant 0 : index
    %c0_6 = arith.constant 0 : index
    %10 = vector.load %arg9[%9, %c0_5, %c0_6] : memref<2x16x128xbf16, #tpu.memory_space<vmem>>, vector<1x16x128xbf16>
    %11 = vector.shape_cast %10 : vector<1x16x128xbf16> to vector<16x128xbf16>
    %c0_7 = arith.constant 0 : index
    %c0_8 = arith.constant 0 : index
    %c0_9 = arith.constant 0 : index
    %12 = vector.load %arg5[%c0_7, %c0_8, %c0_9] : memref<1x128x256xbf16, #tpu.memory_space<vmem>>, vector<1x128x256xbf16>
    %13 = vector.shape_cast %12 : vector<1x128x256xbf16> to vector<128x256xbf16>
    %cst = arith.constant dense<0.000000e+00> : vector<16x256xf32>
    %14 = tpu.matmul %11, %13, %cst {dimension_numbers = #tpu.dot_dimension_numbers<[1], [0], [0], [1], [0, 0, 1, 1], [], []>} : vector<16x128xbf16>, vector<128x256xbf16>, vector<16x256xf32> -> vector<16x256xf32>
    %15 = arith.addf %8, %14 : vector<16x256xf32>
    %c0_10 = arith.constant 0 : index
    %c0_11 = arith.constant 0 : index
    %16 = vector.load %arg10[%c0_10, %c0_11] : memref<16x256xf32, #tpu.memory_space<vmem>>, vector<16x256xf32>
    tpu.vector_store %arg10[%c0_10, %c0_11], %15 {strides = array<i32>} : memref<16x256xf32, #tpu.memory_space<vmem>>, vector<16x256xf32>,
    %c1_i32 = arith.constant 1 : i32
    %17 = arith.cmpi eq, %arg1, %c1_i32 : i32
    %18 = arith.extui %17 : i1 to i32
    %c0_i32_12 = arith.constant 0 : i32
    %19 = arith.cmpi ne, %18, %c0_i32_12 : i32
    scf.if %19 {
      %c0_16 = arith.constant 0 : index
      %c0_17 = arith.constant 0 : index
      %c0_18 = arith.constant 0 : index
      %25 = vector.load %arg6[%c0_16, %c0_17, %c0_18] : memref<1x3x256xf32, #tpu.memory_space<vmem>>, vector<1x3x256xf32>
      %26 = vector.shape_cast %25 : vector<1x3x256xf32> to vector<3x256xf32>
      %27 = vector.extract_strided_slice %26 {offsets = [0, 0], sizes = [1, 256], strides = [1, 1]} : vector<3x256xf32> to vector<1x256xf32>
      %28 = vector.extract_strided_slice %26 {offsets = [1, 0], sizes = [1, 256], strides = [1, 1]} : vector<3x256xf32> to vector<1x256xf32>
      %29 = vector.extract_strided_slice %26 {offsets = [2, 0], sizes = [1, 256], strides = [1, 1]} : vector<3x256xf32> to vector<1x256xf32>
      %c0_19 = arith.constant 0 : index
      %c0_20 = arith.constant 0 : index
      %30 = vector.load %arg10[%c0_19, %c0_20] : memref<16x256xf32, #tpu.memory_space<vmem>>, vector<16x256xf32>
      %31 = vector.broadcast %27 : vector<1x256xf32> to vector<16x256xf32>
      %32 = arith.addf %30, %31 : vector<16x256xf32>
      %cst_21 = arith.constant 0.000000e+00 : f32
      %33 = vector.broadcast %cst_21 : f32 to vector<16x256xf32>
      %34 = arith.maximumf %32, %33 : vector<16x256xf32>
      %c0_22 = arith.constant 0 : index
      %35 = memref.load %arg2[%c0_22] : memref<1xi32, #tpu.memory_space<smem>>
      %36 = arith.sitofp %35 : i32 to f32
      %cst_23 = arith.constant 1.000000e+00 : f32
      %37 = arith.divf %cst_23, %36 : f32
      %c16_i32 = arith.constant 16 : i32
      %38 = arith.subi %c16_i32, %35 : i32
      %39 = arith.sitofp %38 : i32 to f32
      %40 = vector.extract_strided_slice %34 {offsets = [15, 0], sizes = [1, 256], strides = [1, 1]} : vector<16x256xf32> to vector<1x256xf32>
      %cst_24 = arith.constant dense<0.000000e+00> : vector<256xf32>
      %41 = vector.multi_reduction <add>, %34, %cst_24 [0] : vector<16x256xf32> to vector<256xf32>
      %42 = vector.shape_cast %41 : vector<256xf32> to vector<1x256xf32>
      %43 = vector.broadcast %39 : f32 to vector<1x256xf32>
      %44 = arith.mulf %43, %40 : vector<1x256xf32>
      %45 = arith.subf %42, %44 : vector<1x256xf32>
      %46 = vector.broadcast %37 : f32 to vector<1x256xf32>
      %47 = arith.mulf %45, %46 : vector<1x256xf32>
      %48 = arith.mulf %34, %34 : vector<16x256xf32>
      %cst_25 = arith.constant dense<0.000000e+00> : vector<256xf32>
      %49 = vector.multi_reduction <add>, %48, %cst_25 [0] : vector<16x256xf32> to vector<256xf32>
      %50 = vector.shape_cast %49 : vector<256xf32> to vector<1x256xf32>
      %51 = vector.broadcast %39 : f32 to vector<1x256xf32>
      %52 = arith.mulf %51, %40 : vector<1x256xf32>
      %53 = arith.mulf %52, %40 : vector<1x256xf32>
      %54 = arith.subf %50, %53 : vector<1x256xf32>
      %55 = vector.broadcast %37 : f32 to vector<1x256xf32>
      %56 = arith.mulf %54, %55 : vector<1x256xf32>
      %57 = arith.mulf %47, %47 : vector<1x256xf32>
      %58 = arith.subf %56, %57 : vector<1x256xf32>
      %cst_26 = arith.constant 0.000000e+00 : f32
      %59 = vector.broadcast %cst_26 : f32 to vector<1x256xf32>
      %60 = arith.maximumf %58, %59 : vector<1x256xf32>
      %cst_27 = arith.constant 9.99999974E-6 : f32
      %61 = vector.broadcast %cst_27 : f32 to vector<1x256xf32>
      %62 = arith.addf %60, %61 : vector<1x256xf32>
      %63 = math.rsqrt %62 : vector<1x256xf32>
      %64 = arith.mulf %28, %63 : vector<1x256xf32>
      %65 = arith.mulf %47, %64 : vector<1x256xf32>
      %66 = arith.subf %29, %65 : vector<1x256xf32>
      %67 = vector.broadcast %64 : vector<1x256xf32> to vector<16x256xf32>
      %68 = arith.mulf %34, %67 : vector<16x256xf32>
      %69 = vector.broadcast %66 : vector<1x256xf32> to vector<16x256xf32>
      %70 = arith.addf %68, %69 : vector<16x256xf32>
      %71 = arith.truncf %70 : vector<16x256xf32> to vector<16x256xbf16>
      %72 = vector.extract_strided_slice %71 {offsets = [0, 0], sizes = [16, 128], strides = [1, 1]} : vector<16x256xbf16> to vector<16x128xbf16>
      %c0_28 = arith.constant 0 : index
      %c0_29 = arith.constant 0 : index
      %c0_30 = arith.constant 0 : index
      %73 = vector.load %arg9[%c0_28, %c0_29, %c0_30] : memref<2x16x128xbf16, #tpu.memory_space<vmem>>, vector<1x16x128xbf16>
      %74 = vector.shape_cast %73 : vector<1x16x128xbf16> to vector<16x128xbf16>
      %75 = vector.shape_cast %72 : vector<16x128xbf16> to vector<1x16x128xbf16>
      tpu.vector_store %arg9[%c0_28, %c0_29, %c0_30], %75 {strides = array<i32>} : memref<2x16x128xbf16, #tpu.memory_space<vmem>>, vector<1x16x128xbf16>,
      %76 = vector.extract_strided_slice %71 {offsets = [0, 128], sizes = [16, 128], strides = [1, 1]} : vector<16x256xbf16> to vector<16x128xbf16>
      %c1 = arith.constant 1 : index
      %c0_31 = arith.constant 0 : index
      %c0_32 = arith.constant 0 : index
      %77 = vector.load %arg9[%c1, %c0_31, %c0_32] : memref<2x16x128xbf16, #tpu.memory_space<vmem>>, vector<1x16x128xbf16>
      %78 = vector.shape_cast %77 : vector<1x16x128xbf16> to vector<16x128xbf16>
      %79 = vector.shape_cast %76 : vector<16x128xbf16> to vector<1x16x128xbf16>
      tpu.vector_store %arg9[%c1, %c0_31, %c0_32], %79 {strides = array<i32>} : memref<2x16x128xbf16, #tpu.memory_space<vmem>>, vector<1x16x128xbf16>,
    } else {
    }
    %c1_i32_13 = arith.constant 1 : i32
    %20 = arith.cmpi eq, %arg0, %c1_i32_13 : i32
    %c1_i32_14 = arith.constant 1 : i32
    %21 = arith.cmpi eq, %arg1, %c1_i32_14 : i32
    %22 = arith.andi %20, %21 : i1
    %23 = arith.extui %22 : i1 to i32
    %c0_i32_15 = arith.constant 0 : i32
    %24 = arith.cmpi ne, %23, %c0_i32_15 : i32
    scf.if %24 {
      %c0_16 = arith.constant 0 : index
      %c0_17 = arith.constant 0 : index
      %c0_18 = arith.constant 0 : index
      %25 = vector.load %arg9[%c0_16, %c0_17, %c0_18] : memref<2x16x128xbf16, #tpu.memory_space<vmem>>, vector<1x16x128xbf16>
      %26 = vector.shape_cast %25 : vector<1x16x128xbf16> to vector<16x128xbf16>
      %c1 = arith.constant 1 : index
      %c0_19 = arith.constant 0 : index
      %c0_20 = arith.constant 0 : index
      %27 = vector.load %arg9[%c1, %c0_19, %c0_20] : memref<2x16x128xbf16, #tpu.memory_space<vmem>>, vector<1x16x128xbf16>
      %28 = vector.shape_cast %27 : vector<1x16x128xbf16> to vector<16x128xbf16>
      %29 = tpu.concatenate %26, %28 in 1 : vector<16x128xbf16>, vector<16x128xbf16> -> vector<16x256xbf16>
      %c0_21 = arith.constant 0 : index
      %c0_22 = arith.constant 0 : index
      %30 = vector.load %arg7[%c0_21, %c0_22] : memref<256x256xbf16, #tpu.memory_space<vmem>>, vector<256x256xbf16>
      %cst_23 = arith.constant dense<0.000000e+00> : vector<16x256xf32>
      %31 = tpu.matmul %29, %30, %cst_23 {dimension_numbers = #tpu.dot_dimension_numbers<[1], [0], [0], [1], [0, 0, 1, 1], [], []>} : vector<16x256xbf16>, vector<256x256xbf16>, vector<16x256xf32> -> vector<16x256xf32>
      %c0_24 = arith.constant 0 : index
      %c0_25 = arith.constant 0 : index
      %32 = vector.load %arg8[%c0_24, %c0_25] : memref<16x256xf32, #tpu.memory_space<vmem>>, vector<16x256xf32>
      tpu.vector_store %arg8[%c0_24, %c0_25], %31 {strides = array<i32>} : memref<16x256xf32, #tpu.memory_space<vmem>>, vector<16x256xf32>,
    } else {
    }
    return
  }
  func.func @transform_0(%arg0: i32, %arg1: i32, %arg2: memref<1xi32, #tpu.memory_space<smem>>) -> (i32, i32) {
    %c0_i32 = arith.constant 0 : i32
    %c0_i32_0 = arith.constant 0 : i32
    %c0_i32_1 = arith.constant 0 : i32
    return %c0_i32, %c0_i32_0 : i32, i32
  }
  func.func @transform_1(%arg0: i32, %arg1: i32, %arg2: memref<1xi32, #tpu.memory_space<smem>>) -> (i32, i32) {
    %c0_i32 = arith.constant 0 : i32
    %c0_i32_0 = arith.constant 0 : i32
    %c0_i32_1 = arith.constant 0 : i32
    return %c0_i32, %c0_i32_0 : i32, i32
  }
  func.func @transform_2(%arg0: i32, %arg1: i32, %arg2: memref<1xi32, #tpu.memory_space<smem>>) -> (i32, i32, i32) {
    %c0_i32 = arith.constant 0 : i32
    %c0_i32_0 = arith.constant 0 : i32
    return %arg0, %arg1, %c0_i32 : i32, i32, i32
  }
  func.func @transform_3(%arg0: i32, %arg1: i32, %arg2: memref<1xi32, #tpu.memory_space<smem>>) -> (i32, i32, i32) {
    %c0_i32 = arith.constant 0 : i32
    %c0_i32_0 = arith.constant 0 : i32
    %c0_i32_1 = arith.constant 0 : i32
    return %arg0, %c0_i32, %c0_i32_0 : i32, i32, i32
  }
  func.func @transform_4(%arg0: i32, %arg1: i32, %arg2: memref<1xi32, #tpu.memory_space<smem>>) -> (i32, i32) {
    %c0_i32 = arith.constant 0 : i32
    %c0_i32_0 = arith.constant 0 : i32
    %c0_i32_1 = arith.constant 0 : i32
    return %c0_i32, %c0_i32_0 : i32, i32
  }
  func.func @transform_5(%arg0: i32, %arg1: i32, %arg2: memref<1xi32, #tpu.memory_space<smem>>) -> (i32, i32) {
    %c0_i32 = arith.constant 0 : i32
    %c0_i32_0 = arith.constant 0 : i32
    %c0_i32_1 = arith.constant 0 : i32
    return %c0_i32, %c0_i32_0 : i32, i32
  }
}

</mosaic_0001>

<bundles_post_ra>
// kernel: model_forward.1
= control target key start
LH: loop header
LB: loop body
LE: loop exit
PB: predicated region body
PF: predicated region fallthrough
CT: control target
= control target key end

     0   :  { %s1706_s23 = smov 0   ;;  %s1708_s24 = smov 0   ;;  %s2101_s0 = inlined_call_operand.<no memory space> [shape: s32[1], index: 0, kind: input, shape index: {}]   ;;  %s2102_s1 = inlined_call_operand.vmem [shape: bf16[16,384], index: 1, kind: input, shape index: {}]   ;;  %s2103_s2 = inlined_call_operand.vmem [shape: bf16[384,256], index: 2, kind: input, shape index: {}]   ;;  %s2104_s3 = inlined_call_operand.vmem [shape: bf16[2,256,256], index: 3, kind: input, shape index: {}]   ;;  %s2105_s4 = inlined_call_operand.vmem [shape: f32[2,3,256], index: 4, kind: input, shape index: {}]   ;;  %s2106_s5 = inlined_call_operand.vmem [shape: bf16[256,256], index: 5, kind: input, shape index: {}]   ;;  %s2107_s6 = inlined_call_operand.vmem [shape: f32[16,256], index: 6, kind: output, shape index: {}]  }
   0x1   :  { %11 = sst [smem:[#allocation5]] %s2101_s0  ;;  %s1710_s25 = smov 0  }
   0x2   :  { %s1712_s26 = smov 0   ;;  %s1714_s27 = smov 0  }
   0x3 LB: > { %s26_s0 = sadd.s32 1, %s1655_s25  ;;  %s29_s28 = sadd.s32 1, %s1659_s26  ;;  %s1663_s27 = sphi %s1714_s27, %s17_s27   ;;  %s1659_s26 = sphi %s1712_s26, %s2111_s26   ;;  %s1655_s25 = sphi %s1710_s25, %s2110_s25   ;;  %s1651_s24 = sphi %s1708_s24, %s2109_s24   ;;  %s1647_s23 = sphi %s1706_s23, %s2108_s23  }
   0x4   : > { %p27_p0 = scmp.ge.s32.totalorder %s26_s0, 2  ;;  %p1308_p1 = scmp.ge.s32.totalorder %s1663_s27, 1 }
   0x5   : > { %p214_p2 = scmp.lt.s32.totalorder %s1663_s27, 5 }
   0x6   : > { %s2113_s0 = smov (%p27_p0, %s26_s0), 0  ;;  %s2115_s28 = smov (!%p27_p0, %s29_s28), %s1659_s26 }
   0x7   : > { %p215_p3 = pnand %p1308_p1, %p214_p2  ;;  %p31_p4 = scmp.ge.s32.totalorder %s2115_s28, 2 }
   0x8   : > { %s1309_s29 = sshll.u32 (!%p215_p3), %s1647_s23, 4  ;;  %p248_p5 = scmp.lt.s32.totalorder (!%p215_p3), %s1651_s24, 1 }
   0x9   : > { %s2117_s28 = smov (%p31_p4, %s2115_s28), 0  ;;  %218 = sbr.rel (%p215_p3) target bundleno = 920 (0x398), region = 40 }
   0xa   : > { %p250_p6 = scmp.lt.s32.totalorder (!%p215_p3), %s1309_s29, 31  ;;  %p264_p7 = scmp.eq.s32.totalorder (!%p215_p3), %s1651_s24, 0 }
   0xb   : > { %p265_p8 = scmp.eq.s32.totalorder (!%p215_p3), %s1647_s23, 0 }
   0xd   : > { %p266_p9 = pnand (!%p215_p3), %p265_p8, %p264_p7 }
  0x10   : > { %s249_s30 = scalar_select %p248_p5, %s1651_s24, 1 }
  0x11   : > { %s2119_s29 = smov (!%p250_p6, %s1309_s29), 31  ;;  %269 = sbr.rel (%p266_p9) target bundleno = 303 (0x12f), region = 44 }
  0x12   : > { %s1311_s7 = sshll.u32 %s249_s30, 6  ;;  %s1421_s8 = sshll.u32 %s249_s30, 3  ;;  %v1471_v0 = vld [vmem:[%s2103_s2 + $0x4] ss:$8 sps:$4 sm:$0xff] (!%p266_p9)   ;;  %v1473_v1 = vld [vmem:[%s2103_s2] ss:$8 sps:$4 sm:$0xff] (!%p266_p9)  }
  0x13   : > { %s1310_s9 = sshll.u32 %s2119_s29, 1  ;;  %s1747_s12 = scalar_lea.vmem %s2105_s4, %s1421_s8  ;;  %v1665_v2 = vmov (!%p266_p9), 0   ;;  %578 = vmatprep.subr.bf16.mxu1 (!%p266_p9), %v1471_v0  ;;  %v1474_v3 = vld [vmem:[%s2103_s2 + $0x14] ss:$8 sps:$4 sm:$0xff] (!%p266_p9)   ;;  %v1476_v4 = vld [vmem:[%s2103_s2 + $0x10] ss:$8 sps:$4 sm:$0xff] (!%p266_p9)  }
  0x14   : > { %s254_s13 = sadd.s32 %s1311_s7, %s1310_s9  ;;  %653 = vmatprep.mubr.bf16.mxu0 (!%p266_p9), %v1665_v2  ;;  %579 = vmatpush1.bf16.msra.mxu1 (!%p266_p9), %v1473_v1  ;;  %v1477_v5 = vld [vmem:[%s2103_s2 + $0x24] ss:$8 sps:$4 sm:$0xff] (!%p266_p9)   ;;  %v1479_v6 = vld [vmem:[%s2103_s2 + $0x20] ss:$8 sps:$4 sm:$0xff] (!%p266_p9)   ;;  %v1480_v7 = vld [vmem:[%s2103_s2 + $0x34] ss:$8 sps:$4 sm:$0xff] (!%p266_p9)  }
  0x15   : > { %s1312_s14 = sshll.u32 %s254_s13, 2  ;;  %580 = vmatprep.subr.bf16.mxu1 (!%p266_p9), %v1474_v3  ;;  %v1482_v8 = vld [vmem:[%s2103_s2 + $0x30] ss:$8 sps:$4 sm:$0xff] (!%p266_p9)   ;;  %v1495_v9 = vld [vmem:[%s2103_s2 + $0x104] ss:$8 sps:$4 sm:$0xff] (!%p266_p9)  }
  0x16   : > { %s1753_s17 = scalar_lea.vmem %s2104_s3, %s1312_s14  ;;  %v1497_v10 = vld [vmem:[%s2103_s2 + $0x100] ss:$8 sps:$4 sm:$0xff] (!%p266_p9)   ;;  %v1483_v11 = vld [vmem:[%s2103_s2 + $0x44] ss:$8 sps:$4 sm:$0xff] (!%p266_p9)   ;;  %621 = vmatprep.subr.bf16.mxu0 (!%p266_p9), %v1495_v9  ;;  %v1501_v12 = vld [vmem:[%s2103_s2 + $0x114] ss:$8 sps:$4 sm:$0xff] (!%p266_p9)  }
  0x17   : > { %622 = vmatpush1.bf16.msra.mxu0 (!%p266_p9), %v1497_v10  ;;  %v1503_v13 = vld [vmem:[%s2103_s2 + $0x110] ss:$8 sps:$4 sm:$0xff] (!%p266_p9)   ;;  %v1485_v14 = vld [vmem:[%s2103_s2 + $0x40] ss:$8 sps:$4 sm:$0xff] (!%p266_p9)   ;;  %v1486_v15 = vld [vmem:[%s2103_s2 + $0x54] ss:$8 sps:$4 sm:$0xff] (!%p266_p9)  }
  0x18   : > { %581 = vmatpush1.bf16.msra.mxu1 %v1476_v4  ;;  %623 = vmatprep.subr.bf16.mxu0 %v1501_v12  ;;  %v1507_v16 = vld [vmem:[%s2103_s2 + $0x124] ss:$8 sps:$4 sm:$0xff]   ;;  %v1509_v17 = vld [vmem:[%s2103_s2 + $0x120] ss:$8 sps:$4 sm:$0xff]   ;;  %v1488_v18 = vld [vmem:[%s2103_s2 + $0x50] ss:$8 sps:$4 sm:$0xff]  }
  0x19   : > { %582 = vmatprep.subr.bf16.mxu1 %v1477_v5  ;;  %v1513_v19 = vld [vmem:[%s2103_s2 + $0x134] ss:$8 sps:$4 sm:$0xff]   ;;  %v1489_v20 = vld [vmem:[%s2103_s2 + $0x64] ss:$8 sps:$4 sm:$0xff]   ;;  %v1515_v21 = vld [vmem:[%s2103_s2 + $0x130] ss:$8 sps:$4 sm:$0xff]  }
  0x1a   : > { %v1491_v22 = vld [vmem:[%s2103_s2 + $0x60] ss:$8 sps:$4 sm:$0xff]   ;;  %v1519_v23 = vld [vmem:[%s2103_s2 + $0x144] ss:$8 sps:$4 sm:$0xff]   ;;  %v1492_v24 = vld [vmem:[%s2103_s2 + $0x74] ss:$8 sps:$4 sm:$0xff]  }
  0x1b   : > { %624 = vmatpush1.bf16.msra.mxu0 %v1503_v13  ;;  %v1521_v25 = vld [vmem:[%s2103_s2 + $0x140] ss:$8 sps:$4 sm:$0xff]   ;;  %v1494_v26 = vld [vmem:[%s2103_s2 + $0x70] ss:$8 sps:$4 sm:$0xff]   ;;  %v1525_v27 = vld [vmem:[%s2103_s2 + $0x154] ss:$8 sps:$4 sm:$0xff]  }
  0x1c   : > { %583 = vmatpush1.bf16.msra.mxu1 %v1479_v6  ;;  %625 = vmatprep.subr.bf16.mxu0 %v1507_v16  ;;  %v1498_v28 = vld [vmem:[%s2103_s2 + $0x84] ss:$8 sps:$4 sm:$0xff]   ;;  %v1527_v29 = vld [vmem:[%s2103_s2 + $0x150] ss:$8 sps:$4 sm:$0xff]   ;;  %v1500_v30 = vld [vmem:[%s2103_s2 + $0x80] ss:$8 sps:$4 sm:$0xff]  }
  0x1d   : > { %584 = vmatprep.subr.bf16.mxu1 %v1480_v7  ;;  %v1531_v31 = vld [vmem:[%s2103_s2 + $0x164] ss:$8 sps:$4 sm:$0xff]   ;;  %v1504_v32 = vld [vmem:[%s2103_s2 + $0x94] ss:$8 sps:$4 sm:$0xff]   ;;  %v1533_v33 = vld [vmem:[%s2103_s2 + $0x160] ss:$8 sps:$4 sm:$0xff]  }
  0x1e   : > { %v1546_v34 = vld [vmem:[%s2102_s1 + $0x4] ss:$12 sps:$4 sm:$0xff]   ;;  %v1537_v36 = vld [vmem:[%s2103_s2 + $0x174] ss:$8 sps:$4 sm:$0xff]   ;;  %v1512_v39 = vld [vmem:[%s2103_s2 + $0xa0] ss:$8 sps:$4 sm:$0xff]  }
  0x1f   : > { %626 = vmatpush1.bf16.msra.mxu0 %v1509_v17  ;;  %v1506_v35 = vld [vmem:[%s2103_s2 + $0x90] ss:$8 sps:$4 sm:$0xff]   ;;  %v1510_v37 = vld [vmem:[%s2103_s2 + $0xa4] ss:$8 sps:$4 sm:$0xff]   ;;  %610 = vmatprep.mubr.bf16.mxu1 %v1546_v34  ;;  %v1516_v40 = vld [vmem:[%s2103_s2 + $0xb4] ss:$8 sps:$4 sm:$0xff]  }
  0x20   : > { %585 = vmatpush1.bf16.msra.mxu1 %v1482_v8  ;;  %627 = vmatprep.subr.bf16.mxu0 %v1513_v19  ;;  %v1539_v38 = vld [vmem:[%s2103_s2 + $0x170] ss:$8 sps:$4 sm:$0xff]   ;;  %v1543_v41 = vld [vmem:[%s2102_s1 + $0x8] ss:$12 sps:$4 sm:$0xff]   ;;  %v1522_v43 = vld [vmem:[%s2103_s2 + $0xc4] ss:$8 sps:$4 sm:$0xff]  }
  0x21   : > { %586 = vmatprep.subr.bf16.mxu1 %v1483_v11  ;;  %v1518_v42 = vld [vmem:[%s2103_s2 + $0xb0] ss:$8 sps:$4 sm:$0xff]   ;;  %v1524_v44 = vld [vmem:[%s2103_s2 + $0xc0] ss:$8 sps:$4 sm:$0xff]   ;;  %v1528_v45 = vld [vmem:[%s2103_s2 + $0xd4] ss:$8 sps:$4 sm:$0xff]  }
  0x22   : > { %v1530_v46 = vld [vmem:[%s2103_s2 + $0xd0] ss:$8 sps:$4 sm:$0xff]   ;;  %v1534_v47 = vld [vmem:[%s2103_s2 + $0xe4] ss:$8 sps:$4 sm:$0xff]   ;;  %v1536_v48 = vld [vmem:[%s2103_s2 + $0xe0] ss:$8 sps:$4 sm:$0xff]  }
  0x23   : > { %628 = vmatpush1.bf16.msra.mxu0 %v1515_v21  ;;  %v1540_v49 = vld [vmem:[%s2103_s2 + $0xf4] ss:$8 sps:$4 sm:$0xff]   ;;  %v1542_v50 = vld [vmem:[%s2103_s2 + $0xf0] ss:$8 sps:$4 sm:$0xff]   ;;  %v1544_v51 = vld [vmem:[%s2102_s1] ss:$12 sps:$4 sm:$0xff]  }
  0x24   : > { %587 = vmatpush1.bf16.msra.mxu1 %v1485_v14  ;;  %629 = vmatprep.subr.bf16.mxu0 %v1519_v23 }
  0x25   : > { %588 = vmatprep.subr.bf16.mxu1 %v1486_v15 }
  0x27   : > { %630 = vmatpush1.bf16.msra.mxu0 %v1521_v25 }
  0x28   : > { %589 = vmatpush1.bf16.msra.mxu1 %v1488_v18  ;;  %631 = vmatprep.subr.bf16.mxu0 %v1525_v27 }
  0x29   : > { %590 = vmatprep.subr.bf16.mxu1 %v1489_v20 }
  0x2b   : > { %632 = vmatpush1.bf16.msra.mxu0 %v1527_v29 }
  0x2c   : > { %591 = vmatpush1.bf16.msra.mxu1 %v1491_v22  ;;  %633 = vmatprep.subr.bf16.mxu0 %v1531_v31 }
  0x2d   : > { %592 = vmatprep.subr.bf16.mxu1 %v1492_v24 }
  0x2f   : > { %634 = vmatpush1.bf16.msra.mxu0 %v1533_v33 }
  0x30   : > { %593 = vmatpush1.bf16.msra.mxu1 %v1494_v26  ;;  %635 = vmatprep.subr.bf16.mxu0 %v1537_v36 }
  0x31   : > { %594 = vmatprep.subr.bf16.mxu1 %v1498_v28 }
  0x33   : > { %636 = vmatpush1.bf16.msra.mxu0 %v1539_v38 }
  0x34   : > { %595 = vmatpush1.bf16.msra.mxu1 %v1500_v30 }
  0x35   : > { %596 = vmatprep.subr.bf16.mxu1 %v1504_v32 }
  0x36   : > { %654 = vmatmul.mubr.bf16.vlgmr.msra.gmra.mrb[0].mxu0 %v1543_v41 }
  0x38   : > { %597 = vmatpush1.bf16.msra.mxu1 %v1506_v35 }
  0x39   : > { %598 = vmatprep.subr.bf16.mxu1 %v1510_v37 }
  0x3c   : > { %599 = vmatpush1.bf16.msra.mxu1 %v1512_v39 }
  0x3d   : > { %600 = vmatprep.subr.bf16.mxu1 %v1516_v40 }
  0x40   : > { %601 = vmatpush1.bf16.msra.mxu1 %v1518_v42 }
  0x41   : > { %602 = vmatprep.subr.bf16.mxu1 %v1522_v43 }
  0x44   : > { %603 = vmatpush1.bf16.msra.mxu1 %v1524_v44 }
  0x45   : > { %604 = vmatprep.subr.bf16.mxu1 %v1528_v45 }
  0x48   : > { %605 = vmatpush1.bf16.msra.mxu1 %v1530_v46 }
  0x49   : > { %606 = vmatprep.subr.bf16.mxu1 %v1534_v47 }
  0x4c   : > { %607 = vmatpush1.bf16.msra.mxu1 %v1536_v48 }
  0x4d   : > { %608 = vmatprep.subr.bf16.mxu1 %v1540_v49 }
  0x50   : > { %609 = vmatpush1.bf16.msra.mxu1 %v1542_v50 }
  0x53   : > { %611 = vmatmul.mubr.bf16.vlgmr.msra.gmra.mrb[0].mxu1 %v1544_v51 }
 0x109   : > { %v655_v52 = vpop.f32.mrb[0].mxu0 }
 0x10a   : > { %v657_v53 = vpop.f32.mrb[1].mxu0 }
 0x10b   : > { %v659_v54 = vpop.f32.mrb[2].mxu0 }
 0x10c   : > { %v661_v55 = vpop.f32.mrb[3].mxu0 }
 0x126   : > { %v612_v56 = vpop.f32.mrb[0].mxu1 }
 0x127   : > { %v656_v57 = vadd.f32 %v655_v52, %v612_v56  ;;  %v614_v58 = vpop.f32.mrb[1].mxu1 }
 0x128   : > { %v658_v59 = vadd.f32 %v657_v53, %v614_v58  ;;  %v616_v60 = vpop.f32.mrb[2].mxu1 }
 0x129   : > { %v660_v61 = vadd.f32 %v659_v54, %v616_v60  ;;  %v618_v62 = vpop.f32.mrb[3].mxu1 }
 0x12a   : > { %v662_v63 = vadd.f32 %v661_v55, %v618_v62 }
 0x12b   : > { %v664_v0 = vpack.c.bf16 %v660_v61, %v656_v57 }
 0x12c   : > { %v665_v1 = vpack.c.bf16 %v662_v63, %v658_v59 }
 0x12d   : > { %666 = vst [vmem:[#allocation2] sm:$0xff] %v664_v0 }
 0x12e   : > { %668 = vst [vmem:[#allocation2 + $0x8] sm:$0xff] %v665_v1 }
 0x12f PF: > { %p1366_p10 = scmp.ne.s32.totalorder %s1647_s23, 0 }
 0x130   : > { %v1666_v2 = vmov (!%p1366_p10), 0.0  }
 0x131   : > { %671 = sbr.rel (%p1366_p10) target bundleno = 312 (0x138), region = 48  ;;  %672 = vst [vmem:[#allocation3] sm:$0xff] (!%p1366_p10), %v1666_v2  ;;  %673 = vst [vmem:[#allocation3 + $0x8] sm:$0xff] (!%p1366_p10), %v1666_v2 }
 0x132   : > { %674 = vst [vmem:[#allocation3 + $0x10] sm:$0xff] (!%p1366_p10), %v1666_v2  ;;  %675 = vst [vmem:[#allocation3 + $0x18] sm:$0xff] (!%p1366_p10), %v1666_v2 }
 0x138 PF: > { %v1547_v3 = vld [vmem:[%s1753_s17 + $0x4] ss:$8 sps:$4 sm:$0xff]   ;;  %v1549_v4 = vld [vmem:[%s1753_s17] ss:$8 sps:$4 sm:$0xff]   ;;  %v1667_v5 = vmov 0   ;;  %s1367_s30 = sshll.u32 %s1647_s23, 3 }
 0x139   : > { %811 = vmatprep.mubr.bf16.mxu0 %v1667_v5  ;;  %779 = vmatprep.subr.bf16.mxu0 %v1547_v3  ;;  %v1550_v6 = vld [vmem:[%s1753_s17 + $0x14] ss:$8 sps:$4 sm:$0xff]   ;;  %v1552_v7 = vld [vmem:[%s1753_s17 + $0x10] ss:$8 sps:$4 sm:$0xff]   ;;  %v1553_v8 = vld [vmem:[%s1753_s17 + $0x24] ss:$8 sps:$4 sm:$0xff]  }
 0x13a   : > { %780 = vmatpush1.bf16.msra.mxu0 %v1549_v4  ;;  %v1555_v9 = vld [vmem:[%s1753_s17 + $0x20] ss:$8 sps:$4 sm:$0xff]   ;;  %v1556_v10 = vld [vmem:[%s1753_s17 + $0x34] ss:$8 sps:$4 sm:$0xff]   ;;  %v1558_v11 = vld [vmem:[%s1753_s17 + $0x30] ss:$8 sps:$4 sm:$0xff]  }
 0x13b   : > { %781 = vmatprep.subr.bf16.mxu0 %v1550_v6  ;;  %v1559_v12 = vld [vmem:[%s1753_s17 + $0x44] ss:$8 sps:$4 sm:$0xff]   ;;  %v1561_v13 = vld [vmem:[%s1753_s17 + $0x40] ss:$8 sps:$4 sm:$0xff]   ;;  %v1562_v14 = vld [vmem:[%s1753_s17 + $0x54] ss:$8 sps:$4 sm:$0xff]  }
 0x13c   : > { %v1564_v15 = vld [vmem:[%s1753_s17 + $0x50] ss:$8 sps:$4 sm:$0xff]   ;;  %v1565_v16 = vld [vmem:[%s1753_s17 + $0x64] ss:$8 sps:$4 sm:$0xff]   ;;  %v1567_v17 = vld [vmem:[%s1753_s17 + $0x60] ss:$8 sps:$4 sm:$0xff]  }
 0x13d   : > { %v1568_v18 = vld [vmem:[%s1753_s17 + $0x74] ss:$8 sps:$4 sm:$0xff]   ;;  %v1570_v19 = vld [vmem:[%s1753_s17 + $0x70] ss:$8 sps:$4 sm:$0xff]   ;;  %s681_s7 = scalar_lea.vmem [#allocation2], %s1367_s30  ;;  %p830_p11 = scmp.eq.s32.totalorder %s1647_s23, 1 }
 0x13e   : > { %782 = vmatpush1.bf16.msra.mxu0 %v1552_v7  ;;  %v682_v20 = vld [vmem:[%s681_s7] sm:$0xff]  ;;  %v676_v21 = vld [vmem:[#allocation3] sm:$0xff]  ;;  %v677_v22 = vld [vmem:[#allocation3 + $0x8] sm:$0xff]  ;;  %p1384_p12 = scmp.ne.s32.totalorder %s1647_s23, 1 }
 0x13f   : > { %783 = vmatprep.subr.bf16.mxu0 %v1553_v8  ;;  %v678_v24 = vld [vmem:[#allocation3 + $0x10] sm:$0xff]  ;;  %v679_v27 = vld [vmem:[#allocation3 + $0x18] sm:$0xff]  ;;  %s1928_s17 = sld [smem:[#allocation5]] (!%p1384_p12)  ;;  %v840_v34 = vlaneseq (!%p1384_p12) }
 0x140   : > { %v1936_v38 = vld [vmem:[%s1747_s12] sm:$0x77] (!%p1384_p12) }
 0x141   : > { %v1931_v35 = vshrl.u32 (!%p1384_p12), %v840_v34, 7 }
 0x142   : > { %784 = vmatpush1.bf16.msra.mxu0 %v1555_v9 }
 0x143   : > { %785 = vmatprep.subr.bf16.mxu0 %v1556_v10  ;;  %v842_v36 = vsub.s32 (!%p1384_p12), 0, %v1931_v35  ;;  %v846_v37 = vsub.s32 (!%p1384_p12), 4, %v1931_v35 }
 0x145   : > { %s867_s8 = scvt.s32.f32 (!%p1384_p12), %s1928_s17  ;;  %v843_v40 = vrot.slane (!%p1384_p12), %v1936_v38, %v842_v36  ;;  %v847_v41 = vrot.slane (!%p1384_p12), %v1936_v38, %v846_v37  ;;  %s871_s12 = ssub.s32 (!%p1384_p12), 16, %s1928_s17 }
 0x146   : > { %786 = vmatpush1.bf16.msra.mxu0 %v1558_v11  ;;  %s872_s9 = scvt.s32.f32 (!%p1384_p12), %s871_s12 }
 0x147   : > { %787 = vmatprep.subr.bf16.mxu0 %v1559_v12  ;;  %v868_v33 = vstv (!%p1384_p12), %s867_s8  ;;  %v853_v43 = vrot.slane (!%p1384_p12), %v843_v40, %v842_v36  ;;  %v857_v44 = vrot.slane (!%p1384_p12), %v847_v41, %v842_v36 }
 0x148   : > { %1571 = vrcp.f32 (!%p1384_p12), %v868_v33 }
 0x14a   : > { %788 = vmatpush1.bf16.msra.mxu0 %v1561_v13 }
 0x14b   : > { %789 = vmatprep.subr.bf16.mxu0 %v1562_v14 }
 0x14e   : > { %790 = vmatpush1.bf16.msra.mxu0 %v1564_v15 }
 0x14f   : > { %791 = vmatprep.subr.bf16.mxu0 %v1565_v16  ;;  %v887_v16 = vstv (!%p1384_p12), %s872_s9 }
 0x152   : > { %792 = vmatpush1.bf16.msra.mxu0 %v1567_v17  ;;  %v1572_v39 = vpop.eup (!%p1384_p12), %1571 }
 0x153   : > { %793 = vmatprep.subr.bf16.mxu0 %v1568_v18  ;;  %1426 = vpush (!%p1384_p12), %v1572_v39 }
 0x156   : > { %794 = vmatpush1.bf16.msra.mxu0 %v1570_v19 }
 0x159   : > { %812 = vmatmul.mubr.bf16.vlgmr.msra.gmra.mrb[0].mxu0 %v682_v20 }
 0x184   : > { %s1427_s10 = spop (!%p1384_p12), %1426 }
 0x185   : > { %v892_v33 = vstv (!%p1384_p12), %s1427_s10 }
 0x22c   : > { %v813_v23 = vpop.f32.mrb[0].mxu0  ;;  %833 = sbr.rel (%p1384_p12) target bundleno = 636 (0x27c), region = 52 }
 0x22d   : > { %v822_v25 = vadd.f32 %v813_v23, %v676_v21  ;;  %v815_v26 = vpop.f32.mrb[1].mxu0 }
 0x22e   : > { %v823_v28 = vadd.f32 %v815_v26, %v677_v22  ;;  %v817_v29 = vpop.f32.mrb[2].mxu0 }
 0x22f   : > { %826 = vst [vmem:[#allocation3] sm:$0xff] %v822_v25  ;;  %v824_v30 = vadd.f32 %v817_v29, %v678_v24  ;;  %v819_v31 = vpop.f32.mrb[3].mxu0 }
 0x230   : > { %827 = vst [vmem:[#allocation3 + $0x8] sm:$0xff] %v823_v28  ;;  %v825_v32 = vadd.f32 %v819_v31, %v679_v27 }
 0x231   : > { %828 = vst [vmem:[#allocation3 + $0x10] sm:$0xff] %v824_v30 }
 0x232   : > { %829 = vst [vmem:[#allocation3 + $0x18] sm:$0xff] %v825_v32 }
 0x236   : > { %v835_v42 = vld [vmem:[#allocation3] sm:$0xff] }
 0x237   : > { %v836_v45 = vld [vmem:[#allocation3 + $0x8] sm:$0xff]  ;;  %v858_v48 = vadd.f32 %v853_v43, %v835_v42 }
 0x238   : > { %v837_v46 = vld [vmem:[#allocation3 + $0x10] sm:$0xff]  ;;  %v859_v49 = vadd.f32 %v857_v44, %v836_v45 }
 0x239   : > { %v838_v47 = vld [vmem:[#allocation3 + $0x18] sm:$0xff]  ;;  %v860_v50 = vadd.f32 %v853_v43, %v837_v46  ;;  %v1940_v52 = vmax.f32 %v858_v48, 0.0 }
 0x23a   : > { %v861_v51 = vadd.f32 %v857_v44, %v838_v47  ;;  %v1942_v53 = vmax.f32 %v859_v49, 0.0 }
 0x23b   : > { %v1944_v54 = vmax.f32 %v860_v50, 0.0  ;;  %v895_v56 = vmul.f32 %v1940_v52, %v1940_v52 }
 0x23c   : > { %v1946_v55 = vmax.f32 %v861_v51, 0.0  ;;  %v896_v57 = vmul.f32 %v1942_v53, %v1942_v53 }
 0x23d   : > { %v897_v58 = vmul.f32 %v1944_v54, %v1944_v54  ;;  %v873_v60 = vadd.f32 %v1944_v54, %v1940_v52  ;;  %v888_v19 = vmul.f32 %v887_v16, %v1944_v54 }
 0x23e   : > { %v898_v59 = vmul.f32 %v1946_v55, %v1946_v55  ;;  %v880_v61 = vadd.f32 %v1946_v55, %v1942_v53  ;;  %v889_v20 = vmul.f32 %v887_v16, %v1946_v55 }
 0x23f   : > { %v899_v62 = vadd.f32 %v897_v58, %v895_v56  ;;  %v874_v0 = vrot.slane %v873_v60, 4  ;;  %v913_v27 = vmul.f32 %v888_v19, %v1944_v54  ;;  %v939_v56 = vsub.s32 1, %v1931_v35 }
 0x240   : > { %v906_v63 = vadd.f32 %v898_v59, %v896_v57  ;;  %v881_v1 = vrot.slane %v880_v61, 4  ;;  %v914_v28 = vmul.f32 %v889_v20, %v1946_v55  ;;  %v943_v57 = vsub.s32 5, %v1931_v35 }
 0x241   : > { %v900_v2 = vrot.slane %v899_v62, 4  ;;  %v875_v4 = vadd.f32 %v874_v0, %v873_v60 }
 0x242   : > { %v907_v3 = vrot.slane %v906_v63, 4  ;;  %v882_v5 = vadd.f32 %v881_v1, %v880_v61  ;;  %v971_v1 = vsub.s32 2, %v1931_v35 }
 0x243   : > { %v901_v6 = vadd.f32 %v900_v2, %v899_v62  ;;  %v876_v8 = vrot.slane %v875_v4, 2  ;;  %v975_v2 = vsub.s32 6, %v1931_v35 }
 0x244   : > { %v908_v7 = vadd.f32 %v907_v3, %v906_v63  ;;  %v883_v9 = vrot.slane %v882_v5, 2 }
 0x245   : > { %v902_v10 = vrot.slane %v901_v6, 2  ;;  %v877_v12 = vadd.f32 %v876_v8, %v875_v4 }
 0x246   : > { %v909_v11 = vrot.slane %v908_v7, 2  ;;  %v884_v13 = vadd.f32 %v883_v9, %v882_v5 }
 0x247   : > { %v903_v14 = vadd.f32 %v902_v10, %v901_v6  ;;  %v878_v17 = vrot.slane %v877_v12, 1 }
 0x248   : > { %v910_v15 = vadd.f32 %v909_v11, %v908_v7  ;;  %v885_v18 = vrot.slane %v884_v13, 1 }
 0x249   : > { %v904_v21 = vrot.slane %v903_v14, 1  ;;  %v879_v23 = vadd.f32 %v878_v17, %v877_v12 }
 0x24a   : > { %v911_v22 = vrot.slane %v910_v15, 1  ;;  %v886_v24 = vadd.f32 %v885_v18, %v884_v13 }
 0x24b   : > { %v905_v25 = vadd.f32 %v904_v21, %v903_v14  ;;  %v890_v29 = vsub.f32 %v879_v23, %v888_v19 }
 0x24c   : > { %v912_v26 = vadd.f32 %v911_v22, %v910_v15  ;;  %v891_v30 = vsub.f32 %v886_v24, %v889_v20 }
 0x24d   : > { %v915_v31 = vsub.f32 %v905_v25, %v913_v27  ;;  %v893_v34 = vmul.f32 %v892_v33, %v890_v29 }
 0x24e   : > { %v916_v32 = vsub.f32 %v912_v26, %v914_v28  ;;  %v894_v36 = vmul.f32 %v892_v33, %v891_v30 }
 0x24f   : > { %v917_v37 = vmul.f32 %v915_v31, %v892_v33  ;;  %v919_v40 = vmul.f32 %v893_v34, %v893_v34 }
 0x250   : > { %v918_v39 = vmul.f32 %v916_v32, %v892_v33  ;;  %v920_v41 = vmul.f32 %v894_v36, %v894_v36 }
 0x251   : > { %v921_v42 = vsub.f32 %v917_v37, %v919_v40 }
 0x252   : > { %v922_v43 = vsub.f32 %v918_v39, %v920_v41 }
 0x253   : > { %v923_v44 = vmax.f32 %v921_v42, 0.0 }
 0x254   : > { %v924_v45 = vmax.f32 %v922_v43, 0.0 }
 0x255   : > { %v925_v46 = vadd.f32 1e-05, %v923_v44 }
 0x256   : > { %v926_v47 = vadd.f32 1e-05, %v924_v45 }
 0x257   : > { %1573 = vrsqrt.f32 %v925_v46 }
 0x258   : > { %1575 = vrsqrt.f32 %v926_v47 }
 0x261   : > { %v1574_v48 = vpop.eup %1573 }
 0x262   : > { %v1576_v49 = vpop.eup %1575 }
 0x263   : > { %v931_v50 = vcombine.high %v1574_v48, %v1576_v49 }
 0x265   : > { %v1385_v51 = vrot.slane %v931_v50, 10 }
 0x267   : > { %v935_v58 = vmul.f32 %v1385_v51, %v1936_v38 }
 0x269   : > { %v940_v59 = vrot.slane %v935_v58, %v939_v56  ;;  %v944_v60 = vrot.slane %v935_v58, %v943_v57 }
 0x26b   : > { %v947_v61 = vmul.f32 %v940_v59, %v893_v34  ;;  %v948_v62 = vmul.f32 %v944_v60, %v894_v36  ;;  %v959_v3 = vrot.slane %v940_v59, %v939_v56  ;;  %v963_v4 = vrot.slane %v944_v60, %v939_v56 }
 0x26d   : > { %v951_v63 = vcombine.high %v947_v61, %v948_v62  ;;  %v964_v8 = vmul.f32 %v959_v3, %v1940_v52  ;;  %v965_v9 = vmul.f32 %v963_v4, %v1942_v53  ;;  %v966_v10 = vmul.f32 %v959_v3, %v1944_v54 }
 0x26e   : > { %v967_v11 = vmul.f32 %v963_v4, %v1946_v55 }
 0x26f   : > { %v1386_v0 = vrot.slane %v951_v63, 9 }
 0x271   : > { %v955_v5 = vsub.f32 %v1936_v38, %v1386_v0 }
 0x273   : > { %v972_v6 = vrot.slane %v955_v5, %v971_v1  ;;  %v976_v7 = vrot.slane %v955_v5, %v975_v2 }
 0x275   : > { %v982_v12 = vrot.slane %v972_v6, %v971_v1  ;;  %v986_v13 = vrot.slane %v976_v7, %v971_v1 }
 0x277   : > { %v987_v14 = vadd.f32 %v982_v12, %v964_v8  ;;  %v988_v15 = vadd.f32 %v986_v13, %v965_v9  ;;  %v989_v16 = vadd.f32 %v982_v12, %v966_v10  ;;  %v990_v35 = vadd.f32 %v986_v13, %v967_v11 }
 0x279   : > { %v991_v17 = vpack.c.bf16 %v989_v16, %v987_v14  ;;  %v992_v18 = vpack.c.bf16 %v990_v35, %v988_v15 }
 0x27b   : > { %993 = vst [vmem:[#allocation2] sm:$0xff] %v991_v17  ;;  %995 = vst [vmem:[#allocation2 + $0x8] sm:$0xff] %v992_v18 }
 0x27c PF: > { %p996_p13 = scmp.eq.s32.totalorder %s1651_s24, 1 }
 0x27e   : > { %p997_p0 = pnand %p996_p13, %p830_p11 }
 0x27f   : > { %v1577_v38 = vld [vmem:[%s2106_s5 + $0x4] ss:$8 sps:$4 sm:$0xff] (!%p997_p0)   ;;  %v1579_v52 = vld [vmem:[%s2106_s5] ss:$8 sps:$4 sm:$0xff] (!%p997_p0)   ;;  %v1580_v53 = vld [vmem:[%s2106_s5 + $0x14] ss:$8 sps:$4 sm:$0xff] (!%p997_p0)  }
 0x280   : > { %1000 = sbr.rel (%p997_p0) target bundleno = 920 (0x398), region = 56  ;;  %1196 = vmatprep.subr.bf16.mxu0 (!%p997_p0), %v1577_v38  ;;  %v1582_v54 = vld [vmem:[%s2106_s5 + $0x10] ss:$8 sps:$4 sm:$0xff] (!%p997_p0)   ;;  %v1583_v55 = vld [vmem:[%s2106_s5 + $0x24] ss:$8 sps:$4 sm:$0xff] (!%p997_p0)  }
 0x281   : > { %1197 = vmatpush1.bf16.msra.mxu0 (!%p997_p0), %v1579_v52  ;;  %v1585_v19 = vld [vmem:[%s2106_s5 + $0x20] ss:$8 sps:$4 sm:$0xff] (!%p997_p0)   ;;  %v1586_v20 = vld [vmem:[%s2106_s5 + $0x34] ss:$8 sps:$4 sm:$0xff] (!%p997_p0)   ;;  %v1588_v21 = vld [vmem:[%s2106_s5 + $0x30] ss:$8 sps:$4 sm:$0xff] (!%p997_p0)  }
 0x282   : > { %1198 = vmatprep.subr.bf16.mxu0 (!%p997_p0), %v1580_v53  ;;  %v1589_v22 = vld [vmem:[%s2106_s5 + $0x44] ss:$8 sps:$4 sm:$0xff] (!%p997_p0)   ;;  %v1591_v23 = vld [vmem:[%s2106_s5 + $0x40] ss:$8 sps:$4 sm:$0xff] (!%p997_p0)   ;;  %v1592_v24 = vld [vmem:[%s2106_s5 + $0x54] ss:$8 sps:$4 sm:$0xff] (!%p997_p0)  }
 0x283   : > { %v1594_v25 = vld [vmem:[%s2106_s5 + $0x50] ss:$8 sps:$4 sm:$0xff] (!%p997_p0)   ;;  %v1595_v26 = vld [vmem:[%s2106_s5 + $0x64] ss:$8 sps:$4 sm:$0xff] (!%p997_p0)   ;;  %v1597_v28 = vld [vmem:[%s2106_s5 + $0x60] ss:$8 sps:$4 sm:$0xff] (!%p997_p0)  }
 0x284   : > { %v1003_v27 = vld [vmem:[#allocation2 + $0x8] sm:$0xff] (!%p997_p0)  ;;  %v1598_v29 = vld [vmem:[%s2106_s5 + $0x74] ss:$8 sps:$4 sm:$0xff] (!%p997_p0)   ;;  %v1600_v30 = vld [vmem:[%s2106_s5 + $0x70] ss:$8 sps:$4 sm:$0xff] (!%p997_p0)  }
 0x285   : > { %1199 = vmatpush1.bf16.msra.mxu0 (!%p997_p0), %v1582_v54  ;;  %1228 = vmatprep.mubr.bf16.mxu0 (!%p997_p0), %v1003_v27  ;;  %v1601_v31 = vld [vmem:[%s2106_s5 + $0x84] ss:$8 sps:$4 sm:$0xff] (!%p997_p0)   ;;  %v1603_v32 = vld [vmem:[%s2106_s5 + $0x80] ss:$8 sps:$4 sm:$0xff] (!%p997_p0)   ;;  %v1604_v33 = vld [vmem:[%s2106_s5 + $0x94] ss:$8 sps:$4 sm:$0xff] (!%p997_p0)  }
 0x286   : > { %1200 = vmatprep.subr.bf16.mxu0 (!%p997_p0), %v1583_v55  ;;  %v1606_v34 = vld [vmem:[%s2106_s5 + $0x90] ss:$8 sps:$4 sm:$0xff] (!%p997_p0)   ;;  %v1607_v36 = vld [vmem:[%s2106_s5 + $0xa4] ss:$8 sps:$4 sm:$0xff] (!%p997_p0)   ;;  %v1609_v37 = vld [vmem:[%s2106_s5 + $0xa0] ss:$8 sps:$4 sm:$0xff] (!%p997_p0)  }
 0x287   : > { %v1610_v39 = vld [vmem:[%s2106_s5 + $0xb4] ss:$8 sps:$4 sm:$0xff]   ;;  %v1612_v40 = vld [vmem:[%s2106_s5 + $0xb0] ss:$8 sps:$4 sm:$0xff]   ;;  %v1613_v41 = vld [vmem:[%s2106_s5 + $0xc4] ss:$8 sps:$4 sm:$0xff]  }
 0x288   : > { %v1615_v42 = vld [vmem:[%s2106_s5 + $0xc0] ss:$8 sps:$4 sm:$0xff]   ;;  %v1616_v43 = vld [vmem:[%s2106_s5 + $0xd4] ss:$8 sps:$4 sm:$0xff]   ;;  %v1618_v44 = vld [vmem:[%s2106_s5 + $0xd0] ss:$8 sps:$4 sm:$0xff]  }
 0x289   : > { %1201 = vmatpush1.bf16.msra.mxu0 %v1585_v19  ;;  %v1619_v45 = vld [vmem:[%s2106_s5 + $0xe4] ss:$8 sps:$4 sm:$0xff]   ;;  %v1621_v46 = vld [vmem:[%s2106_s5 + $0xe0] ss:$8 sps:$4 sm:$0xff]   ;;  %v1622_v47 = vld [vmem:[%s2106_s5 + $0xf4] ss:$8 sps:$4 sm:$0xff]  }
 0x28a   : > { %1202 = vmatprep.subr.bf16.mxu0 %v1586_v20  ;;  %v1624_v48 = vld [vmem:[%s2106_s5 + $0xf0] ss:$8 sps:$4 sm:$0xff]   ;;  %v1001_v49 = vld [vmem:[#allocation2] sm:$0xff] }
 0x28d   : > { %1203 = vmatpush1.bf16.msra.mxu0 %v1588_v21 }
 0x28e   : > { %1204 = vmatprep.subr.bf16.mxu0 %v1589_v22 }
 0x291   : > { %1205 = vmatpush1.bf16.msra.mxu0 %v1591_v23 }
 0x292   : > { %1206 = vmatprep.subr.bf16.mxu0 %v1592_v24 }
 0x295   : > { %1207 = vmatpush1.bf16.msra.mxu0 %v1594_v25 }
 0x296   : > { %1208 = vmatprep.subr.bf16.mxu0 %v1595_v26 }
 0x299   : > { %1209 = vmatpush1.bf16.msra.mxu0 %v1597_v28 }
 0x29a   : > { %1210 = vmatprep.subr.bf16.mxu0 %v1598_v29 }
 0x29d   : > { %1211 = vmatpush1.bf16.msra.mxu0 %v1600_v30 }
 0x29e   : > { %1212 = vmatprep.subr.bf16.mxu0 %v1601_v31 }
 0x2a1   : > { %1213 = vmatpush1.bf16.msra.mxu0 %v1603_v32 }
 0x2a2   : > { %1214 = vmatprep.subr.bf16.mxu0 %v1604_v33 }
 0x2a5   : > { %1215 = vmatpush1.bf16.msra.mxu0 %v1606_v34 }
 0x2a6   : > { %1216 = vmatprep.subr.bf16.mxu0 %v1607_v36 }
 0x2a9   : > { %1217 = vmatpush1.bf16.msra.mxu0 %v1609_v37 }
 0x2aa   : > { %1218 = vmatprep.subr.bf16.mxu0 %v1610_v39 }
 0x2ad   : > { %1219 = vmatpush1.bf16.msra.mxu0 %v1612_v40 }
 0x2ae   : > { %1220 = vmatprep.subr.bf16.mxu0 %v1613_v41 }
 0x2b1   : > { %1221 = vmatpush1.bf16.msra.mxu0 %v1615_v42 }
 0x2b2   : > { %1222 = vmatprep.subr.bf16.mxu0 %v1616_v43 }
 0x2b5   : > { %1223 = vmatpush1.bf16.msra.mxu0 %v1618_v44 }
 0x2b6   : > { %1224 = vmatprep.subr.bf16.mxu0 %v1619_v45 }
 0x2b9   : > { %1225 = vmatpush1.bf16.msra.mxu0 %v1621_v46 }
 0x2ba   : > { %1226 = vmatprep.subr.bf16.mxu0 %v1622_v47 }
 0x2bd   : > { %1227 = vmatpush1.bf16.msra.mxu0 %v1624_v48 }
 0x2c0   : > { %1229 = vmatmul.mubr.bf16.vlgmr.msra.gmra.mrb[0].mxu0 %v1001_v49 }
 0x393   : > { %v1230_v50 = vpop.f32.mrb[0].mxu0 }
 0x394   : > { %1239 = vst [vmem:[%s2107_s6] sm:$0xff] %v1230_v50  ;;  %v1232_v51 = vpop.f32.mrb[1].mxu0 }
 0x395   : > { %1240 = vst [vmem:[%s2107_s6 + $0x8] sm:$0xff] %v1232_v51  ;;  %v1234_v56 = vpop.f32.mrb[2].mxu0 }
 0x396   : > { %1241 = vst [vmem:[%s2107_s6 + $0x10] sm:$0xff] %v1234_v56  ;;  %v1236_v57 = vpop.f32.mrb[3].mxu0 }
 0x397   : > { %1242 = vst [vmem:[%s2107_s6 + $0x18] sm:$0xff] %v1236_v57 }
 0x398 PF: > { %s17_s27 = sadd.s32 1, %s1663_s27   ;;  %s2108_s23 = smov %s1655_s25 }
 0x399   : > { %p14_p1 = scmp.ge.s32.totalorder %s17_s27, 6   ;;  %s2109_s24 = smov %s1659_s26 }
 0x39a   : > { %s2110_s25 = smov %s2113_s0  ;;  %s2111_s26 = smov %s2117_s28 }
 0x39b   :  { %16 = sbr.rel (!%p14_p1) target bundleno = 3 (0x3), region = 89 }

</bundles_post_ra>
